<compile_context>
chip_gen: v6e
topology: v6e:2x2x1
jax: 0.10.0
libtpu: 0.0.40
codegen_flags: <defaults>
</compile_context>

<pallas_src>
import functools
from typing import NamedTuple

import jax
import jax.numpy as jnp
from jax.experimental import pallas as pl
from jax.experimental.pallas import tpu as pltpu


def _round_up(v, m):
    return (v + m - 1) // m * m


def _vmem_budget_bytes():
    """Per-generation scoped-VMEM budget with compiler headroom."""
    cap = 64 << 20                                    # conservative default (v7x)
    try:
        info = pltpu.get_tpu_info()
        cap = int(getattr(info, "vmem_capacity_bytes", cap))
    except Exception:
        pass
    # 13/16 of physical, capped: 128 MiB -> 104 MiB (v5e/v6e), 64 MiB -> 52 MiB (v7x).
    return int(min(cap * 13 // 16, 104 << 20))


def _pick_tm(rows, row_min, tm_req, avail_bytes, per_row_bytes):
    """Row-tile size: as big as VMEM allows, but keep >= 2 row tiles when possible
    so the 'parallel' row axis can shard across v7x's 2 TensorCores."""
    rows_aligned = _round_up(rows, row_min)
    tm_max = max(row_min, (max(avail_bytes, 0) // max(per_row_bytes, 1))
                 // row_min * row_min)
    tm = max(row_min, min(tm_req, tm_max, rows_aligned))
    if rows_aligned // tm < 2 and rows_aligned >= 2 * row_min:
        tm = max(row_min, min(tm, _round_up(rows_aligned // 2, row_min)))
    return tm


def _layer_norm(y, g, beta, eps, d_in):
    """LayerNorm over the real d_in lanes of a lane-padded f32 tile.

    Padded lanes of y are exactly 0 (zero-padded W2/b2/x), so the mean over the
    real lanes is exact; the centered values are masked so the two-pass variance
    (numerically safer than E[y^2]-mean^2) stays exact as well.
    """
    d_pad = y.shape[-1]
    inv_d = 1.0 / d_in
    mean = jnp.sum(y, axis=-1, keepdims=True) * inv_d
    yc = y - mean
    if d_in != d_pad:
        lane = jax.lax.broadcasted_iota(jnp.int32, y.shape, y.ndim - 1)
        yc = jnp.where(lane < d_in, yc, 0.0)
    var = jnp.sum(yc * yc, axis=-1, keepdims=True) * inv_d
    return yc * jax.lax.rsqrt(var + eps) * g + beta      # rsqrt -> EUP slot


def _ffn_kernel_resident(x_ref, w1_ref, b1_ref, w2_ref, b2_ref, g_ref, beta_ref,
                         o_ref, *, eps, d_in, compute_dtype):
    """Single-pass body: weights fully VMEM-resident, 1-D grid over row tiles."""
    x = x_ref[...]
    xc = x.astype(compute_dtype)
    # Conv1d(d_in -> d_hid, k=1):  x @ W1^T + b1, ReLU.     (MXU + VPU)
    h = jnp.dot(xc, w1_ref[...], preferred_element_type=jnp.float32)
    h = jnp.maximum(h + b1_ref[...], 0.0)
    # Conv1d(d_hid -> d_in, k=1):  h @ W2^T + b2.           (MXU)
    y = jnp.dot(h.astype(compute_dtype), w2_ref[...],
                preferred_element_type=jnp.float32)
    # Dropout: identity in eval / inference mode.
    # TODO(synk): training-mode dropout (pltpu.prng_random_bits mask) not emitted.
    y = y + b2_ref[...] + x.astype(jnp.float32)            # bias + residual
    o_ref[...] = _layer_norm(y, g_ref[...], beta_ref[...], eps, d_in
                             ).astype(o_ref.dtype)


def _ffn_kernel_tiled(x_ref, w1_ref, b1_ref, w2_ref, b2_ref, g_ref, beta_ref,
                      o_ref, acc_ref, *, eps, d_in, compute_dtype):
    """Fallback body: hidden dim tiled on grid axis 1, f32 accumulator."""
    k = pl.program_id(1)
    x = x_ref[...]
    xc = x.astype(compute_dtype)
    h = jnp.dot(xc, w1_ref[...], preferred_element_type=jnp.float32)
    h = jnp.maximum(h + b1_ref[...], 0.0)
    part = jnp.dot(h.astype(compute_dtype), w2_ref[...],
                   preferred_element_type=jnp.float32)

    @pl.when(k == 0)
    def _():
        acc_ref[...] = part                                 # no separate zero-init pass

    @pl.when(k > 0)
    def _():
        acc_ref[...] += part

    @pl.when(k == pl.num_programs(1) - 1)
    def _():
        # Dropout: identity in eval mode (see TODO above).
        y = acc_ref[...] + b2_ref[...] + x.astype(jnp.float32)
        o_ref[...] = _layer_norm(y, g_ref[...], beta_ref[...], eps, d_in
                                 ).astype(o_ref.dtype)


class FFNParams(NamedTuple):
    w1_t: jax.Array      # (d_in_p, d_hid_p), compute dtype
    b1: jax.Array        # (1, d_hid_p), f32
    w2_t: jax.Array      # (d_hid_p, d_in_p), compute dtype
    b2: jax.Array        # (1, d_in_p), f32
    gamma: jax.Array     # (1, d_in_p), f32
    beta: jax.Array      # (1, d_in_p), f32
    d_in: int
    d_hid: int


def prepare_ffn_params(w1, b1, w2, b2, gamma, beta, *, compute_dtype=jnp.float32):
    """One-time (init-time) weight transpose + lane-dense zero padding.

    torch Conv1d(k=1) layout: w1 (d_hid, d_in), w2 (d_in, d_hid).
    Keeping this out of the per-call path avoids a full HBM round-trip of both
    weight matrices on every forward.
    """
    d_hid, d_in = w1.shape
    d_in_p = _round_up(d_in, 128)
    d_hid_p = _round_up(d_hid, 128)
    w1_t = jnp.pad(jnp.asarray(w1, compute_dtype).T,
                   ((0, d_in_p - d_in), (0, d_hid_p - d_hid)))
    w2_t = jnp.pad(jnp.asarray(w2, compute_dtype).T,
                   ((0, d_hid_p - d_hid), (0, d_in_p - d_in)))
    b1_p = jnp.pad(jnp.asarray(b1, jnp.float32), (0, d_hid_p - d_hid)
                   ).reshape(1, d_hid_p)
    b2_p = jnp.pad(jnp.asarray(b2, jnp.float32), (0, d_in_p - d_in)
                   ).reshape(1, d_in_p)
    g_p = jnp.pad(jnp.asarray(gamma, jnp.float32), (0, d_in_p - d_in)
                  ).reshape(1, d_in_p)
    beta_p = jnp.pad(jnp.asarray(beta, jnp.float32), (0, d_in_p - d_in)
                     ).reshape(1, d_in_p)
    return FFNParams(w1_t, b1_p, w2_t, b2_p, g_p, beta_p, int(d_in), int(d_hid))


def positionwise_feed_forward(x, params: FFNParams, *, eps=1e-5, tm=512,
                              hidden_block=512, force_hidden_tiling=False):
    """x: (B, L, d_in) -> (B, L, d_in)."""
    B, L, d_in = x.shape
    assert d_in == params.d_in, "params were prepared for a different d_in"
    d_in_p = params.w2_t.shape[1]
    d_hid_p = params.w2_t.shape[0]
    compute_dtype = params.w1_t.dtype
    rows = B * L
    out_dtype = x.dtype
    isz_x = jnp.dtype(x.dtype).itemsize
    isz_c = jnp.dtype(compute_dtype).itemsize
    # Sub-32-bit activations pack 2 rows per sublane: keep row tiles 16-aligned.
    row_min = 8 if isz_x >= 4 else 16

    budget = _vmem_budget_bytes()
    slack = 2 << 20

    # ---- can the full (padded) weights live in VMEM? (2x: pipeline buffers) ----
    weight_bytes = 2 * d_in_p * d_hid_p * isz_c
    bias_bytes = (d_hid_p + 3 * d_in_p) * 4
    fixed_res = 2 * (weight_bytes + bias_bytes) + slack
    per_row_res = 4 * d_in_p * isz_x + 4 * d_hid_p + 8 * d_in_p   # x/out dbl-buf + f32 temps
    use_resident = (not force_hidden_tiling and
                    fixed_res + row_min * per_row_res <= budget)

    kernel_kwargs = dict(eps=eps, d_in=d_in, compute_dtype=compute_dtype)

    if use_resident:
        tm_ = _pick_tm(rows, row_min, tm, budget - fixed_res, per_row_res)
        rows_p = _round_up(rows, tm_)
        grid = (rows_p // tm_,)
        in_specs = [
            pl.BlockSpec((tm_, d_in_p), lambda i: (i, 0)),        # x tile
            pl.BlockSpec((d_in_p, d_hid_p), lambda i: (0, 0)),    # W1^T (resident)
            pl.BlockSpec((1, d_hid_p), lambda i: (0, 0)),         # b1
            pl.BlockSpec((d_hid_p, d_in_p), lambda i: (0, 0)),    # W2^T (resident)
            pl.BlockSpec((1, d_in_p), lambda i: (0, 0)),          # b2
            pl.BlockSpec((1, d_in_p), lambda i: (0, 0)),          # gamma
            pl.BlockSpec((1, d_in_p), lambda i: (0, 0)),          # beta
        ]
        out_specs = pl.BlockSpec((tm_, d_in_p), lambda i: (i, 0))
        scratch_shapes = []
        dim_sem = ("parallel",)
        kernel = functools.partial(_ffn_kernel_resident, **kernel_kwargs)
        weight_stream_factor = 1                                   # weights DMA'd once
    else:
        # Hidden-dim block size: lane-dense and dividing d_hid_p.
        tk = min(_round_up(hidden_block, 128), d_hid_p)
        while d_hid_p % tk:
            tk -= 128
        fixed_tiled = 2 * (2 * tk * d_in_p * isz_c + (tk + 3 * d_in_p) * 4) + slack
        per_row_tiled = 4 * d_in_p * isz_x + 4 * d_in_p + 4 * tk + 8 * d_in_p
        tm_ = _pick_tm(rows, row_min, tm, budget - fixed_tiled, per_row_tiled)
        rows_p = _round_up(rows, tm_)
        grid = (rows_p // tm_, d_hid_p // tk)
        in_specs = [
            pl.BlockSpec((tm_, d_in_p), lambda i, k: (i, 0)),     # x tile (resident over k)
            # NOTE(v5e): if profiling shows exposed weight DMA, add
            # pipeline_mode=pl.Buffered(3) on the two weight specs below.
            pl.BlockSpec((d_in_p, tk), lambda i, k: (0, k)),      # W1^T hidden block
            pl.BlockSpec((1, tk), lambda i, k: (0, k)),           # b1 hidden block
            pl.BlockSpec((tk, d_in_p), lambda i, k: (k, 0)),      # W2^T hidden block
            pl.BlockSpec((1, d_in_p), lambda i, k: (0, 0)),       # b2
            pl.BlockSpec((1, d_in_p), lambda i, k: (0, 0)),       # gamma
            pl.BlockSpec((1, d_in_p), lambda i, k: (0, 0)),       # beta
        ]
        out_specs = pl.BlockSpec((tm_, d_in_p), lambda i, k: (i, 0))
        scratch_shapes = [pltpu.VMEM((tm_, d_in_p), jnp.float32)]
        dim_sem = ("parallel", "arbitrary")
        kernel = functools.partial(_ffn_kernel_tiled, **kernel_kwargs)
        weight_stream_factor = rows_p // tm_                       # weights re-streamed per row tile

    # Skip the activation pad (full HBM round-trip) when shapes are aligned.
    x2d = x.reshape(rows, d_in)
    padded = (rows_p != rows) or (d_in_p != d_in)
    if padded:
        x2d = jnp.pad(x2d, ((0, rows_p - rows), (0, d_in_p - d_in)))

    flops = 4 * rows_p * d_in_p * d_hid_p                 # two matmuls, 2 flops/MAC
    bytes_accessed = (2 * rows_p * d_in_p * isz_x
                      + weight_stream_factor * (weight_bytes + bias_bytes))

    out2d = pl.pallas_call(
        kernel,
        out_shape=jax.ShapeDtypeStruct((rows_p, d_in_p), out_dtype),
        grid_spec=pltpu.PrefetchScalarGridSpec(
            num_scalar_prefetch=0,
            grid=grid,
            in_specs=in_specs,
            out_specs=out_specs,
            scratch_shapes=scratch_shapes),
        compiler_params=pltpu.CompilerParams(
            dimension_semantics=dim_sem,
            vmem_limit_bytes=int(budget)),
        cost_estimate=pl.CostEstimate(
            flops=flops, transcendentals=rows_p, bytes_accessed=bytes_accessed),
    )(x2d, params.w1_t, params.b1, params.w2_t, params.b2,
      params.gamma, params.beta)

    if padded:
        out2d = out2d[:rows, :d_in]
    return out2d.reshape(B, L, d_in)


def _reference(x, w1, b1, w2, b2, gamma, beta, eps=1e-5):
    # Pure-JAX mirror of the PyTorch forward (eval mode).
    h = jnp.maximum(jnp.einsum('bld,hd->blh', x, w1) + b1, 0.0)
    y = jnp.einsum('blh,dh->bld', h, w2) + b2
    y = y + x
    mean = jnp.mean(y, axis=-1, keepdims=True)
    var = jnp.var(y, axis=-1, keepdims=True)
    return (y - mean) / jnp.sqrt(var + eps) * gamma + beta


if __name__ == "__main__":
    B, L, d_in, d_hid = 2, 8, 32, 64

    key = jax.random.PRNGKey(0)
    kx, k1, kb1, k2, kb2, k3, kb3, k4, kb4 = jax.random.split(key, 9)

    x = jax.random.normal(kx, (B, L, d_in), dtype=jnp.float32)

    # torch Conv1d(k=1) layout: (out_ch, in_ch).
    w1 = jax.random.normal(k1, (d_hid, d_in), dtype=jnp.float32) * 0.1
    b1 = jax.random.normal(kb1, (d_hid,), dtype=jnp.float32) * 0.1
    w2 = jax.random.normal(k2, (d_in, d_hid), dtype=jnp.float32) * 0.1
    b2 = jax.random.normal(kb2, (d_in,), dtype=jnp.float32) * 0.1
    gamma = jnp.ones((d_in,), dtype=jnp.float32)
    beta = jnp.zeros((d_in,), dtype=jnp.float32)

    ref = _reference(x, w1, b1, w2, b2, gamma, beta)

    # 1) Primary path: weights VMEM-resident, f32 compute (exact vs reference).
    params_f32 = prepare_ffn_params(w1, b1, w2, b2, gamma, beta,
                                    compute_dtype=jnp.float32)
    out = jax.block_until_ready(positionwise_feed_forward(x, params_f32))
    assert out.shape == (B, L, d_in)
    assert jnp.allclose(out, ref, atol=1e-4, rtol=1e-4), \
        float(jnp.max(jnp.abs(out - ref)))

    # 2) bf16 matmul operands (MXU-native) with f32 accumulation -> relaxed tolerance.
    params_bf16 = prepare_ffn_params(w1, b1, w2, b2, gamma, beta,
                                     compute_dtype=jnp.bfloat16)
    out_bf = jax.block_until_ready(positionwise_feed_forward(x, params_bf16))
    assert jnp.allclose(out_bf, ref, atol=5e-2, rtol=5e-2), \
        float(jnp.max(jnp.abs(out_bf - ref)))

    # 3) Fallback hidden-tiled (2-D grid, accumulator) path, forced for coverage.
    d_hid_big = 320
    w1b = jax.random.normal(k3, (d_hid_big, d_in), dtype=jnp.float32) * 0.1
    b1b = jax.random.normal(kb3, (d_hid_big,), dtype=jnp.float32) * 0.1
    w2b = jax.random.normal(k4, (d_in, d_hid_big), dtype=jnp.float32) * 0.1
    b2b = jax.random.normal(kb4, (d_in,), dtype=jnp.float32) * 0.1
    params_big = prepare_ffn_params(w1b, b1b, w2b, b2b, gamma, beta,
                                    compute_dtype=jnp.float32)
    out_tiled = jax.block_until_ready(
        positionwise_feed_forward(x, params_big, force_hidden_tiling=True,
                                  hidden_block=128))
    ref_tiled = _reference(x, w1b, b1b, w2b, b2b, gamma, beta)
    assert jnp.allclose(out_tiled, ref_tiled, atol=1e-4, rtol=1e-4), \
        float(jnp.max(jnp.abs(out_tiled - ref_tiled)))

    print("KERNEL_OK")
</pallas_src>

<mosaic_0001>
module attributes {stable_mosaic.version = 11 : i64} {
  func.func @_ffn_kernel_resident(%arg0: i32, %arg1: memref<8x128xf32, #tpu.memory_space<vmem>>, %arg2: memref<128x128xf32, #tpu.memory_space<vmem>>, %arg3: memref<1x128xf32, #tpu.memory_space<vmem>>, %arg4: memref<128x128xf32, #tpu.memory_space<vmem>>, %arg5: memref<1x128xf32, #tpu.memory_space<vmem>>, %arg6: memref<1x128xf32, #tpu.memory_space<vmem>>, %arg7: memref<1x128xf32, #tpu.memory_space<vmem>>, %arg8: memref<8x128xf32, #tpu.memory_space<vmem>>) attributes {dimension_semantics = [#tpu.dimension_semantics<parallel>], iteration_bounds = array<i64: 2>, scalar_prefetch = 0 : i64, scratch_operands = 0 : i64, tpu.core_type = #tpu.core_type<tc>, window_params = [{transform_indices = @transform_0, window_bounds = array<i64: 8, 128>}, {pipeline_mode = #tpu.pipeline_mode<synchronous>, transform_indices = @transform_1, window_bounds = array<i64: 128, 128>}, {pipeline_mode = #tpu.pipeline_mode<synchronous>, transform_indices = @transform_2, window_bounds = array<i64: 1, 128>}, {pipeline_mode = #tpu.pipeline_mode<synchronous>, transform_indices = @transform_3, window_bounds = array<i64: 128, 128>}, {pipeline_mode = #tpu.pipeline_mode<synchronous>, transform_indices = @transform_4, window_bounds = array<i64: 1, 128>}, {pipeline_mode = #tpu.pipeline_mode<synchronous>, transform_indices = @transform_5, window_bounds = array<i64: 1, 128>}, {pipeline_mode = #tpu.pipeline_mode<synchronous>, transform_indices = @transform_6, window_bounds = array<i64: 1, 128>}, {transform_indices = @transform_7, window_bounds = array<i64: 8, 128>}]} {
    %c0 = arith.constant 0 : index
    %c0_0 = arith.constant 0 : index
    %0 = vector.load %arg1[%c0, %c0_0] : memref<8x128xf32, #tpu.memory_space<vmem>>, vector<8x128xf32>
    %c0_1 = arith.constant 0 : index
    %c0_2 = arith.constant 0 : index
    %1 = vector.load %arg2[%c0_1, %c0_2] : memref<128x128xf32, #tpu.memory_space<vmem>>, vector<128x128xf32>
    %cst = arith.constant dense<0.000000e+00> : vector<8x128xf32>
    %2 = tpu.matmul %0, %1, %cst {dimension_numbers = #tpu.dot_dimension_numbers<[1], [0], [0], [1], [0, 0, 1, 1], [], []>} : vector<8x128xf32>, vector<128x128xf32>, vector<8x128xf32> -> vector<8x128xf32>
    %c0_3 = arith.constant 0 : index
    %c0_4 = arith.constant 0 : index
    %3 = vector.load %arg3[%c0_3, %c0_4] : memref<1x128xf32, #tpu.memory_space<vmem>>, vector<1x128xf32>
    %4 = vector.broadcast %3 : vector<1x128xf32> to vector<8x128xf32>
    %5 = arith.addf %2, %4 : vector<8x128xf32>
    %cst_5 = arith.constant 0.000000e+00 : f32
    %6 = vector.broadcast %cst_5 : f32 to vector<8x128xf32>
    %7 = arith.maximumf %5, %6 : vector<8x128xf32>
    %c0_6 = arith.constant 0 : index
    %c0_7 = arith.constant 0 : index
    %8 = vector.load %arg4[%c0_6, %c0_7] : memref<128x128xf32, #tpu.memory_space<vmem>>, vector<128x128xf32>
    %cst_8 = arith.constant dense<0.000000e+00> : vector<8x128xf32>
    %9 = tpu.matmul %7, %8, %cst_8 {dimension_numbers = #tpu.dot_dimension_numbers<[1], [0], [0], [1], [0, 0, 1, 1], [], []>} : vector<8x128xf32>, vector<128x128xf32>, vector<8x128xf32> -> vector<8x128xf32>
    %c0_9 = arith.constant 0 : index
    %c0_10 = arith.constant 0 : index
    %10 = vector.load %arg5[%c0_9, %c0_10] : memref<1x128xf32, #tpu.memory_space<vmem>>, vector<1x128xf32>
    %11 = vector.broadcast %10 : vector<1x128xf32> to vector<8x128xf32>
    %12 = arith.addf %9, %11 : vector<8x128xf32>
    %13 = arith.addf %12, %0 : vector<8x128xf32>
    %c0_11 = arith.constant 0 : index
    %c0_12 = arith.constant 0 : index
    %14 = vector.load %arg6[%c0_11, %c0_12] : memref<1x128xf32, #tpu.memory_space<vmem>>, vector<1x128xf32>
    %c0_13 = arith.constant 0 : index
    %c0_14 = arith.constant 0 : index
    %15 = vector.load %arg7[%c0_13, %c0_14] : memref<1x128xf32, #tpu.memory_space<vmem>>, vector<1x128xf32>
    %cst_15 = arith.constant dense<0.000000e+00> : vector<8xf32>
    %16 = vector.multi_reduction <add>, %13, %cst_15 [1] : vector<8x128xf32> to vector<8xf32>
    %17 = vector.shape_cast %16 : vector<8xf32> to vector<8x1xf32>
    %cst_16 = arith.constant 3.125000e-02 : f32
    %18 = vector.broadcast %cst_16 : f32 to vector<8x1xf32>
    %19 = arith.mulf %17, %18 : vector<8x1xf32>
    %20 = vector.broadcast %19 : vector<8x1xf32> to vector<8x128xf32>
    %21 = arith.subf %13, %20 : vector<8x128xf32>
    %22 = tpu.iota {dimensions = array<i32: 1>} : vector<8x128xi32>
    %c32_i32 = arith.constant 32 : i32
    %23 = vector.broadcast %c32_i32 : i32 to vector<8x128xi32>
    %24 = arith.cmpi slt, %22, %23 : vector<8x128xi32>
    %cst_17 = arith.constant 0.000000e+00 : f32
    %25 = vector.broadcast %cst_17 : f32 to vector<8x128xf32>
    %26 = arith.select %24, %21, %25 : vector<8x128xi1>, vector<8x128xf32>
    %27 = arith.mulf %26, %26 : vector<8x128xf32>
    %cst_18 = arith.constant dense<0.000000e+00> : vector<8xf32>
    %28 = vector.multi_reduction <add>, %27, %cst_18 [1] : vector<8x128xf32> to vector<8xf32>
    %29 = vector.shape_cast %28 : vector<8xf32> to vector<8x1xf32>
    %cst_19 = arith.constant 3.125000e-02 : f32
    %30 = vector.broadcast %cst_19 : f32 to vector<8x1xf32>
    %31 = arith.mulf %29, %30 : vector<8x1xf32>
    %cst_20 = arith.constant 9.99999974E-6 : f32
    %32 = vector.broadcast %cst_20 : f32 to vector<8x1xf32>
    %33 = arith.addf %31, %32 : vector<8x1xf32>
    %34 = math.rsqrt %33 : vector<8x1xf32>
    %35 = vector.broadcast %34 : vector<8x1xf32> to vector<8x128xf32>
    %36 = arith.mulf %26, %35 : vector<8x128xf32>
    %37 = vector.broadcast %14 : vector<1x128xf32> to vector<8x128xf32>
    %38 = arith.mulf %36, %37 : vector<8x128xf32>
    %39 = vector.broadcast %15 : vector<1x128xf32> to vector<8x128xf32>
    %40 = arith.addf %38, %39 : vector<8x128xf32>
    %c0_21 = arith.constant 0 : index
    %c0_22 = arith.constant 0 : index
    %41 = vector.load %arg8[%c0_21, %c0_22] : memref<8x128xf32, #tpu.memory_space<vmem>>, vector<8x128xf32>
    tpu.vector_store %arg8[%c0_21, %c0_22], %40 {strides = array<i32>} : memref<8x128xf32, #tpu.memory_space<vmem>>, vector<8x128xf32>,
    return
  }
  func.func @transform_0(%arg0: i32) -> (i32, i32) {
    %c0_i32 = arith.constant 0 : i32
    %c0_i32_0 = arith.constant 0 : i32
    return %arg0, %c0_i32 : i32, i32
  }
  func.func @transform_1(%arg0: i32) -> (i32, i32) {
    %c0_i32 = arith.constant 0 : i32
    %c0_i32_0 = arith.constant 0 : i32
    %c0_i32_1 = arith.constant 0 : i32
    return %c0_i32, %c0_i32_0 : i32, i32
  }
  func.func @transform_2(%arg0: i32) -> (i32, i32) {
    %c0_i32 = arith.constant 0 : i32
    %c0_i32_0 = arith.constant 0 : i32
    %c0_i32_1 = arith.constant 0 : i32
    return %c0_i32, %c0_i32_0 : i32, i32
  }
  func.func @transform_3(%arg0: i32) -> (i32, i32) {
    %c0_i32 = arith.constant 0 : i32
    %c0_i32_0 = arith.constant 0 : i32
    %c0_i32_1 = arith.constant 0 : i32
    return %c0_i32, %c0_i32_0 : i32, i32
  }
  func.func @transform_4(%arg0: i32) -> (i32, i32) {
    %c0_i32 = arith.constant 0 : i32
    %c0_i32_0 = arith.constant 0 : i32
    %c0_i32_1 = arith.constant 0 : i32
    return %c0_i32, %c0_i32_0 : i32, i32
  }
  func.func @transform_5(%arg0: i32) -> (i32, i32) {
    %c0_i32 = arith.constant 0 : i32
    %c0_i32_0 = arith.constant 0 : i32
    %c0_i32_1 = arith.constant 0 : i32
    return %c0_i32, %c0_i32_0 : i32, i32
  }
  func.func @transform_6(%arg0: i32) -> (i32, i32) {
    %c0_i32 = arith.constant 0 : i32
    %c0_i32_0 = arith.constant 0 : i32
    %c0_i32_1 = arith.constant 0 : i32
    return %c0_i32, %c0_i32_0 : i32, i32
  }
  func.func @transform_7(%arg0: i32) -> (i32, i32) {
    %c0_i32 = arith.constant 0 : i32
    %c0_i32_0 = arith.constant 0 : i32
    return %arg0, %c0_i32 : i32, i32
  }
}

</mosaic_0001>

<bundles_post_ra>
// kernel: tpu_custom_call.1
= control target key start
LH: loop header
LB: loop body
LE: loop exit
PB: predicated region body
PF: predicated region fallthrough
CT: control target
= control target key end

     0   :  { %s1260_s0 = inlined_call_operand.hbm [shape: f32[16,128], index: 0, kind: input, shape index: {}]   ;;  %s1261_s1 = inlined_call_operand.hbm [shape: f32[128,128], index: 1, kind: input, shape index: {}]   ;;  %s1262_s2 = inlined_call_operand.vmem [shape: f32[1,128], index: 2, kind: input, shape index: {}]   ;;  %s1263_s3 = inlined_call_operand.hbm [shape: f32[128,128], index: 3, kind: input, shape index: {}]   ;;  %s1264_s4 = inlined_call_operand.vmem [shape: f32[1,128], index: 4, kind: input, shape index: {}]   ;;  %s1265_s5 = inlined_call_operand.vmem [shape: f32[1,128], index: 5, kind: input, shape index: {}]   ;;  %s1266_s6 = inlined_call_operand.vmem [shape: f32[1,128], index: 6, kind: input, shape index: {}]   ;;  %s1267_s7 = inlined_call_operand.hbm [shape: f32[16,128], index: 7, kind: output, shape index: {}]  }
   0x1   :  { %1272 = sst [smem:[#allocation12_spill]] %s1261_s1 }
   0x2   :  { %1273 = sst [smem:[#allocation13_spill]] %s1263_s3 }
   0x3   :  { %12 = vsyncpa [#allocation3], 0 }
   0x4   :  { %14 = vsyncpa [#allocation3 + $0x1], 0 }
   0x5   :  { %15 = vsyncpa [#allocation6], 0 }
   0x6   :  { %16 = vsyncpa [#allocation4], 0 }
   0x7   :  { %18 = vsyncpa [#allocation4 + $0x1], 0  ;;  %s1042_s24 = smov 0   ;;  %s1044_s25 = smov 0  }
   0x8   :  { %s1046_s26 = smov 0   ;;  %s1048_s27 = smov 0  }
   0x9 LB: > { %s1063_s28 = sadd.s32 4294967295, %s992_s27   ;;  %s647_s29 = sadd.s32 4294967294, %s992_s27   ;;  %s992_s27 = sphi %s1048_s27, %s1293_s27   ;;  %s988_s26 = sphi %s1046_s26, %s1292_s26   ;;  %s984_s25 = sphi %s1044_s25, %s1291_s25   ;;  %s980_s24 = sphi %s1042_s24, %s1290_s24  }
   0xa   : > { %p44_p0 = scmp.ne.s32.totalorder %s984_s25, %s980_s24  ;;  %p1268_p1 = scmp.eq.s32.totalorder %s1063_s28, 0 }
   0xb   : > { %p200_p3 = scmp.eq.s32.totalorder %s647_s29, 1  ;;  %p648_p5 = scmp.ge.s32.totalorder %s992_s27, 1 }
   0xc   : > { %p1072_p4 = por %p1268_p1, %p44_p0  ;;  %p207_p7 = scmp.lt.s32.totalorder %s992_s27, 3 }
   0xd   : > { %p1077_p6 = por %p200_p3, %p44_p0  ;;  %s994_s10 = smov [#allocation5]  }
   0xe   : > { %s1274_s30 = scalar_select %p1072_p4, 1, 0 }
   0xf   : > { %s1275_s8 = scalar_select %p1077_p6, 1, 0 }
  0x10   : > { %p1082_p8 = pnand %p648_p5, %p207_p7  ;;  %s219_s11 = sshll.u32 %s994_s10, 4  ;;  %s220_s11 = int_to_ptr.vmem [resolvable:$true] %s219_s11 }
  0x11   : > { %s995_s13 = smov [#allocation7]   ;;  %s855_s15 = scalar_lea.vmem %s220_s11, 2048 }
  0x12   : > { %s1276_s9 = scalar_select %p1082_p8, 1, 0 }
  0x13   : > { %p783_p9 = pneg %p1082_p8  ;;  %s235_s14 = sshll.u32 %s995_s13, 4  ;;  %s236_s14 = int_to_ptr.vmem [resolvable:$true] %s235_s14 }
  0x14   : > { %p856_p13 = scmp.ne.s32.totalorder %s220_s11, %s855_s15  ;;  %p863_p5 = scmp.lt.s32.totalorder %s220_s11, %s220_s11 }
  0x15   : > { %p1091_p11 = pnand %p783_p9, %p1268_p1  ;;  %p864_p7 = scmp.lt.s32.totalorder %s855_s15, %s855_s15 }
  0x17   : > { %p846_p12 = pneg %p1091_p11  ;;  %p865_p10 = por %p864_p7, %p863_p5 }
  0x19   : > { %p858_p0 = pnand %p856_p13, %p846_p12 }
  0x1b   : > { %p859_p3 = pneg %p858_p0 }
  0x1d   : > { %p866_p9 = pnand %p865_p10, %p859_p3 }
  0x1f   : > { %869 = shalt.err (!%p866_p9)
}
  0x20   : > { %s996_s16 = smov 128   ;;  %s997_s17 = smov 8  }
  0x21   : > { %s1278_s1 = sld [smem:[#allocation12_spill]]  ;;  %s881_s20 = scalar_lea.vmem %s236_s14, 2048 }
  0x22   : > { %p882_p1 = scmp.ne.s32.totalorder %s236_s14, %s881_s20  ;;  %p889_p2 = scmp.lt.s32.totalorder %s236_s14, %s236_s14 }
  0x23   : > { %p890_p6 = scmp.lt.s32.totalorder %s881_s20, %s881_s20 }
  0x24   : > { %p884_p13 = pnand %p882_p1, %p846_p12 }
  0x25   : > { %p891_p5 = por %p890_p6, %p889_p2 }
  0x26   : > { %p885_p0 = pneg %p884_p13 }
  0x27   : > { %786 = dma.hbm_to_vmem [thread:$0]  (!%p1091_p11), %s1278_s1, 2048, %s220_s11, [#allocation6], %s996_s16, %s996_s16, %s997_s17  }
  0x28   : > { %p892_p10 = pnand %p891_p5, %p885_p0 }
  0x2a   : > { %895 = shalt.err (!%p892_p10)
}
  0x2b   : > { %s1279_s3 = sld [smem:[#allocation13_spill]]  ;;  %s1114_s23 = sadd.s32 1, %s992_s27  }
  0x2c   : > { %s31_s29 = sadd.s32 1, %s988_s26  ;;  %s28_s10 = ssub.s32 %s992_s27, %s1114_s23 }
  0x2d   : > { %p38_p1 = scmp.ne.s32.totalorder %s988_s26, %s984_s25  ;;  %p29_p2 = scmp.eq.s32.totalorder %s28_s10, 0 }
  0x2e   : > { %p39_p6 = scmp.eq.s32.totalorder %s992_s27, 0  ;;  %p1280_p12 = scmp.eq.s32.totalorder %s1063_s28, 1 }
  0x2f   : > { %p800_p7 = scmp.lt.s32.totalorder %s992_s27, 2  ;;  %s258_s13 = sand.u32 1, %s988_s26  }
  0x30   : > { %p1124_p3 = por %p1280_p12, %p38_p1  ;;  %p40_p9 = por %p39_p6, %p38_p1 }
  0x31   : > { %789 = dma.hbm_to_vmem [thread:$0]  (!%p1091_p11), %s1279_s3, 2048, %s236_s14, [#allocation6], %s996_s16, %s996_s16, %s997_s17  }
  0x32   : > { %s1281_s11 = scalar_select %p1124_p3, 1, 0 }
  0x33   : > { %s1130_s12 = scalar_select %p29_p2, %s988_s26, %s31_s29  }
  0x34   : > { %s652_s15 = sshll.u32 %s258_s13, 3  ;;  %s653_s14 = sshll.u32 %s992_s27, 7 }
  0x35   : > { %s1137_s18 = scalar_lea.hbm %s1260_s0, %s653_s14  ;;  %s262_s19 = scalar_lea.vmem [#allocation2], %s652_s15 }
  0x36   : > { %s269_s20 = sshll.u32 %s262_s19, 4  ;;  %p1139_p11 = pnand %p800_p7, %p40_p9  ;;  %s270_s20 = int_to_ptr.vmem [resolvable:$true] %s269_s20 }
  0x37   : > { %s259_s22 = scalar_lea.sflag [#allocation3], %s258_s13  ;;  %s896_s29 = scalar_lea.hbm %s1137_s18, 128 }
  0x38   : > { %p897_p13 = scmp.ne.s32.totalorder %s1137_s18, %s896_s29  ;;  %p898_p0 = pneg %p1139_p11 }
  0x39   : > { %s901_s16 = scalar_lea.hbm %s1260_s0, 256  ;;  %p902_p1 = scmp.lt.s32.totalorder %s1137_s18, %s1260_s0 }
  0x3a   : > { %p899_p5 = pnand %p898_p0, %p897_p13  ;;  %p903_p2 = scmp.lt.s32.totalorder %s901_s16, %s896_s29 }
  0x3c   : > { %p900_p10 = pneg %p899_p5  ;;  %p904_p6 = por %p903_p2, %p902_p1 }
  0x3e   : > { %p905_p12 = pnand %p904_p6, %p900_p10 }
  0x40   : > { %908 = shalt.err (!%p905_p12)
}
  0x41   : > { %s909_s19 = scalar_lea.vmem %s270_s20, 128  ;;  %s998_s13 = smov [#allocation2]  }
  0x42   : > { %p910_p7 = scmp.ne.s32.totalorder %s270_s20, %s909_s19  ;;  %s914_s1 = sshll.u32 %s998_s13, 4  ;;  %s915_s1 = int_to_ptr.vmem [resolvable:$false] %s914_s1 }
  0x43   : > { %s916_s3 = scalar_lea.vmem %s915_s1, 256  ;;  %p917_p13 = scmp.lt.s32.totalorder %s270_s20, %s915_s1 }
  0x44   : > { %p912_p9 = pnand %p910_p7, %p898_p0  ;;  %p918_p5 = scmp.lt.s32.totalorder %s916_s3, %s909_s19 }
  0x46   : > { %p913_p3 = pneg %p912_p9  ;;  %p919_p4 = por %p918_p5, %p917_p13 }
  0x48   : > { %p920_p8 = pnand %p919_p4, %p913_p3 }
  0x4a   : > { %923 = shalt.err (!%p920_p8)
}
  0x4b   : > { %793 = dma.hbm_to_vmem [thread:$0]  (!%p1139_p11), %s1137_s18, 128, %s270_s20, %s259_s22  }
  0x4c   : > { %p1283_p10 = scmp.ne.s32.totalorder %s1276_s9, 0 }
  0x4d   : > { %s1160_s29 = sand.u32 (!%p1283_p10), 1, %s984_s25   ;;  %p1284_p4 = scmp.ne.s32.totalorder (!%p1283_p10), %s1274_s30, 0 }
  0x4e   : > { %278 = sbr.rel (%p1283_p10) target bundleno = 835 (0x343), region = 48  ;;  %s655_s10 = sshll.u32 (!%p1283_p10), %s1160_s29, 3 }
  0x4f   : > { %s281_s1 = scalar_lea.sflag (!%p1283_p10), [#allocation3], %s1160_s29  ;;  %s1166_s3 = scalar_lea.vmem (!%p1283_p10), [#allocation2], %s655_s10 }
  0x53   : > { %967 = dma.done.wait (%p1284_p4), %s281_s1, 128  }
  0x54   : > { %969 = vsyncadd (%p1284_p4), %s281_s1, 4294967168  ;;  %p1285_p8 = scmp.eq.s32.totalorder %s1063_s28, 0 }
  0x56   : > { %971 = dma.done.wait (%p1285_p8), [#allocation6], 4096   ;;  %p1286_p3 = pmov %p1285_p8 }
  0x57   : > { %v999_v0 = vmov 0.0   ;;  %vm1000_vm0 = vmmov 0   ;;  %v339_v1 = vld [vmem:[#allocation5 + $0x78] sm:$0xff]  ;;  %v338_v2 = vld [vmem:[#allocation5 + $0x70] sm:$0xff]  ;;  %v337_v3 = vld [vmem:[#allocation5 + $0x68] sm:$0xff]  ;;  %v518_v44 = vlaneseq  ;;  %s664_s17 = sshll.u32 %s1063_s28, 7 }
  0x58   : > { %973 = vsyncadd (%p1286_p3), [#allocation6], 4294963200  ;;  %701 = vmatprep.subr.mxu0 %v999_v0  ;;  %733 = vmatprep.mubr.msk.f32.mxu0 %vm1000_vm0, %v999_v0  ;;  %v336_v4 = vld [vmem:[#allocation5 + $0x60] sm:$0xff]  ;;  %v433_v5 = vld [vmem:[#allocation7 + $0x78] sm:$0xff]  ;;  %s322_s15 = scalar_lea.vmem [#allocation8], %s655_s10  ;;  %s545_s30 = scalar_lea.sflag [#allocation4], %s1160_s29 }
  0x59   : > { %736 = vmatprep.subr.mxu1 %v999_v0  ;;  %768 = vmatprep.mubr.msk.f32.mxu1 %vm1000_vm0, %v999_v0  ;;  %v335_v6 = vld [vmem:[#allocation5 + $0x58] sm:$0xff]  ;;  %v432_v7 = vld [vmem:[#allocation7 + $0x70] sm:$0xff]  ;;  %v431_v8 = vld [vmem:[#allocation7 + $0x68] sm:$0xff]  ;;  %v519_v45 = vand.u32 127, %v518_v44  ;;  %s558_s19 = sshll.u32 %s322_s15, 4  ;;  %p1287_p0 = scmp.ne.s32.totalorder %s1281_s11, 0  ;;  %s559_s19 = int_to_ptr.vmem [resolvable:$true] %s558_s19 }
  0x5a   : > { %702 = vmatpush3.msra.mxu0 %v339_v1  ;;  %737 = vmatpush3.msra.mxu1 %v433_v5  ;;  %v334_v9 = vld [vmem:[#allocation5 + $0x50] sm:$0xff]  ;;  %v430_v10 = vld [vmem:[#allocation7 + $0x60] sm:$0xff]  ;;  %v333_v11 = vld [vmem:[#allocation5 + $0x48] sm:$0xff]  ;;  %s924_s9 = scalar_lea.vmem %s559_s19, 128  ;;  %s1001_s18 = smov [#allocation8]  }
  0x5b   : > { %703 = vmatprep.subr.mxu0 %v999_v0  ;;  %738 = vmatprep.subr.mxu1 %v999_v0  ;;  %v429_v12 = vld [vmem:[#allocation7 + $0x58] sm:$0xff]  ;;  %v332_v13 = vld [vmem:[#allocation5 + $0x40] sm:$0xff]  ;;  %v428_v14 = vld [vmem:[#allocation7 + $0x50] sm:$0xff]  ;;  %vm520_vm1 = vcmp.lt.s32.totalorder %v519_v45, 32  ;;  %p925_p11 = scmp.ne.s32.totalorder %s559_s19, %s924_s9  ;;  %s928_s20 = sshll.u32 %s1001_s18, 4  ;;  %s929_s20 = int_to_ptr.vmem [resolvable:$false] %s928_s20 }
  0x5c   : > { %704 = vmatpush3.msra.mxu0 %v338_v2  ;;  %739 = vmatpush3.msra.mxu1 %v432_v7  ;;  %v331_v15 = vld [vmem:[#allocation5 + $0x38] sm:$0xff]  ;;  %v427_v16 = vld [vmem:[#allocation7 + $0x48] sm:$0xff]  ;;  %v330_v17 = vld [vmem:[#allocation5 + $0x30] sm:$0xff]  ;;  %s930_s28 = scalar_lea.vmem %s929_s20, 256  ;;  %p931_p6 = scmp.lt.s32.totalorder %s559_s19, %s929_s20 }
  0x5d   : > { %705 = vmatprep.subr.mxu0 %v999_v0  ;;  %740 = vmatprep.subr.mxu1 %v999_v0  ;;  %v426_v18 = vld [vmem:[#allocation7 + $0x40] sm:$0xff]  ;;  %v329_v19 = vld [vmem:[#allocation5 + $0x28] sm:$0xff]  ;;  %v425_v20 = vld [vmem:[#allocation7 + $0x38] sm:$0xff]  ;;  %p926_p1 = pnand %p925_p11, %p1287_p0  ;;  %p932_p12 = scmp.lt.s32.totalorder %s930_s28, %s924_s9 }
  0x5e   : > { %706 = vmatpush3.msra.mxu0 %v337_v3  ;;  %741 = vmatpush3.msra.mxu1 %v431_v8  ;;  %v328_v21 = vld [vmem:[#allocation5 + $0x20] sm:$0xff]  ;;  %v424_v22 = vld [vmem:[#allocation7 + $0x30] sm:$0xff]  ;;  %v327_v23 = vld [vmem:[#allocation5 + $0x18] sm:$0xff] }
  0x5f   : > { %707 = vmatprep.subr.mxu0 %v999_v0  ;;  %742 = vmatprep.subr.mxu1 %v999_v0  ;;  %v423_v24 = vld [vmem:[#allocation7 + $0x28] sm:$0xff]  ;;  %v326_v25 = vld [vmem:[#allocation5 + $0x10] sm:$0xff]  ;;  %v422_v26 = vld [vmem:[#allocation7 + $0x20] sm:$0xff]  ;;  %p927_p2 = pneg %p926_p1  ;;  %p933_p7 = por %p932_p12, %p931_p6 }
  0x60   : > { %708 = vmatpush3.msra.mxu0 %v336_v4  ;;  %743 = vmatpush3.msra.mxu1 %v430_v10  ;;  %v325_v27 = vld [vmem:[#allocation5 + $0x8] sm:$0xff]  ;;  %v421_v28 = vld [vmem:[#allocation7 + $0x18] sm:$0xff]  ;;  %v324_v29 = vld [vmem:[#allocation5] sm:$0xff] }
  0x61   : > { %709 = vmatprep.subr.mxu0 %v999_v0  ;;  %744 = vmatprep.subr.mxu1 %v999_v0  ;;  %v323_v30 = vld [vmem:[%s1166_s3] sm:$0xff]  ;;  %v419_v32 = vld [vmem:[#allocation7 + $0x8] sm:$0xff]  ;;  %v418_v33 = vld [vmem:[#allocation7] sm:$0xff]  ;;  %s556_s3 = scalar_lea.hbm %s1267_s7, %s664_s17  ;;  %p934_p9 = pnand %p933_p7, %p927_p2 }
  0x62   : > { %710 = vmatpush3.msra.mxu0 %v335_v6  ;;  %745 = vmatpush3.msra.mxu1 %v429_v12  ;;  %v420_v31 = vld [vmem:[#allocation7 + $0x10] sm:$0xff] }
  0x63   : > { %711 = vmatprep.subr.mxu0 %v999_v0  ;;  %746 = vmatprep.subr.mxu1 %v999_v0  ;;  %v659_v34 = vld [vmem:[%s1262_s2] ss:$0 sm:$0xff] }
  0x64   : > { %712 = vmatpush3.msra.mxu0 %v334_v9  ;;  %747 = vmatpush3.msra.mxu1 %v428_v14  ;;  %v660_v39 = vld [vmem:[%s1264_s4] ss:$0 sm:$0xff] }
  0x65   : > { %713 = vmatprep.subr.mxu0 %v999_v0  ;;  %748 = vmatprep.subr.mxu1 %v999_v0  ;;  %v661_v55 = vld [vmem:[%s1265_s5] ss:$0 sm:$0xff] }
  0x66   : > { %714 = vmatpush3.msra.mxu0 %v333_v11  ;;  %749 = vmatpush3.msra.mxu1 %v427_v16  ;;  %v662_v57 = vld [vmem:[%s1266_s6] ss:$0 sm:$0xff] }
  0x67   : > { %715 = vmatprep.subr.mxu0 %v999_v0  ;;  %750 = vmatprep.subr.mxu1 %v999_v0 }
  0x68   : > { %716 = vmatpush3.msra.mxu0 %v332_v13  ;;  %751 = vmatpush3.msra.mxu1 %v426_v18 }
  0x69   : > { %717 = vmatprep.subr.mxu0 %v999_v0  ;;  %752 = vmatprep.subr.mxu1 %v999_v0 }
  0x6a   : > { %718 = vmatpush3.msra.mxu0 %v331_v15  ;;  %753 = vmatpush3.msra.mxu1 %v425_v20 }
  0x6b   : > { %719 = vmatprep.subr.mxu0 %v999_v0  ;;  %754 = vmatprep.subr.mxu1 %v999_v0 }
  0x6c   : > { %720 = vmatpush3.msra.mxu0 %v330_v17  ;;  %755 = vmatpush3.msra.mxu1 %v424_v22 }
  0x6d   : > { %721 = vmatprep.subr.mxu0 %v999_v0  ;;  %756 = vmatprep.subr.mxu1 %v999_v0 }
  0x6e   : > { %722 = vmatpush3.msra.mxu0 %v329_v19  ;;  %757 = vmatpush3.msra.mxu1 %v423_v24 }
  0x6f   : > { %723 = vmatprep.subr.mxu0 %v999_v0  ;;  %758 = vmatprep.subr.mxu1 %v999_v0 }
  0x70   : > { %724 = vmatpush3.msra.mxu0 %v328_v21  ;;  %759 = vmatpush3.msra.mxu1 %v422_v26 }
  0x71   : > { %725 = vmatprep.subr.mxu0 %v999_v0  ;;  %760 = vmatprep.subr.mxu1 %v999_v0 }
  0x72   : > { %726 = vmatpush3.msra.mxu0 %v327_v23  ;;  %761 = vmatpush3.msra.mxu1 %v421_v28 }
  0x73   : > { %727 = vmatprep.subr.mxu0 %v999_v0  ;;  %762 = vmatprep.subr.mxu1 %v999_v0 }
  0x74   : > { %728 = vmatpush3.msra.mxu0 %v326_v25  ;;  %763 = vmatpush3.msra.mxu1 %v420_v31 }
  0x75   : > { %729 = vmatprep.subr.mxu0 %v999_v0  ;;  %764 = vmatprep.subr.mxu1 %v999_v0 }
  0x76   : > { %730 = vmatpush3.msra.mxu0 %v325_v27  ;;  %765 = vmatpush3.msra.mxu1 %v419_v32 }
  0x77   : > { %731 = vmatprep.subr.mxu0 %v999_v0  ;;  %766 = vmatprep.subr.mxu1 %v999_v0 }
  0x78   : > { %732 = vmatpush3.msra.mxu0 %v324_v29  ;;  %767 = vmatpush3.msra.mxu1 %v418_v33 }
  0x79   : > { %734 = vmatmul.mubr.f32.vlgmr.msra.gmra.mxu0 %v323_v30 }
 0x139   : > { %v413_v35 = vpop.f32.mrf.mxu0 }
 0x13a   : > { %v414_v36 = vadd.f32 %v659_v34, %v413_v35 }
 0x13b   : > { %v735_v37 = vpop.f32.mrf.mxu0 }
 0x13c   : > { %v417_v38 = vmax.f32 %v414_v36, 0.0 }
 0x13e   : > { %769 = vmatmul.mubr.f32.vlgmr.msra.gmra.mxu1 %v417_v38 }
 0x1fe   : > { %v507_v40 = vpop.f32.mrf.mxu1 }
 0x1ff   : > { %v508_v41 = vadd.f32 %v660_v39, %v507_v40 }
 0x200   : > { %v770_v42 = vpop.f32.mrf.mxu1 }
 0x201   : > { %v511_v43 = vadd.f32 %v508_v41, %v323_v30 }
 0x203   : > { %514 = vadd.xlane.f32.xlu0 %v511_v43 }
 0x28c   : > { %v515_v46 = vpop.xlane.xlu0 %514 }
 0x28d   : > { %v516_v47 = vmul.f32 0.03125, %v515_v46 }
 0x28f   : > { %v517_v48 = vsub.f32 %v511_v43, %v516_v47 }
 0x291   : > { %v521_v49 = vsel %vm520_vm1, %v517_v48, 0.0 }
 0x292   : > { %v522_v50 = vmul.f32 %v521_v49, %v521_v49 }
 0x294   : > { %523 = vadd.xlane.f32.xlu0 %v522_v50 }
 0x31d   : > { %v524_v51 = vpop.xlane.xlu0 %523 }
 0x31e   : > { %v525_v52 = vmul.f32 0.03125, %v524_v51 }
 0x320   : > { %v526_v53 = vadd.f32 1e-05, %v525_v52 }
 0x322   : > { %842 = vrsqrt.f32 %v526_v53 }
 0x32f   : > { %v843_v54 = vpop.eup %842 }
 0x330   : > { %v528_v56 = vmul.f32 %v843_v54, %v521_v49 }
 0x332   : > { %v535_v58 = vmul.f32 %v661_v55, %v528_v56 }
 0x334   : > { %v542_v59 = vadd.f32 %v662_v57, %v535_v58 }
 0x336   : > { %543 = vst [vmem:[%s322_s15] sm:$0xff] %v542_v59 }
 0x337   : > { %937 = shalt.err (!%p934_p9)
}
 0x338   : > { %s938_s10 = scalar_lea.hbm %s556_s3, 128  ;;  %s942_s22 = scalar_lea.hbm %s1267_s7, 256 }
 0x339   : > { %p939_p13 = scmp.ne.s32.totalorder %s556_s3, %s938_s10  ;;  %p943_p4 = scmp.lt.s32.totalorder %s556_s3, %s1267_s7 }
 0x33a   : > { %p944_p8 = scmp.lt.s32.totalorder %s942_s22, %s938_s10 }
 0x33b   : > { %p940_p5 = pnand %p939_p13, %p1287_p0 }
 0x33c   : > { %p945_p3 = por %p944_p8, %p943_p4 }
 0x33d   : > { %p941_p10 = pneg %p940_p5 }
 0x33f   : > { %p946_p11 = pnand %p945_p3, %p941_p10 }
 0x341   : > { %949 = shalt.err (!%p946_p11)
}
 0x342   : > { %781 = dma.vmem_to_hbm [thread:$0]  (%p1287_p0), %s559_s19, 128, %s556_s3, %s545_s30  }
 0x343 PF: > { %s570_s17 = sand.u32 1, %s980_s24   ;;  %p1288_p1 = scmp.ne.s32.totalorder %s1275_s8, 0 }
 0x344   : > { %p1289_p2 = scmp.ge.s32.totalorder %s992_s27, 2  ;;  %s571_s15 = scalar_lea.sflag [#allocation4], %s570_s17 }
 0x346   : > { %p795_p6 = pnand %p1289_p2, %p1288_p1 }
 0x348   : > { %p796_p12 = pneg %p795_p6 }
 0x34a   : > { %975 = dma.done.wait (%p796_p12), %s571_s15, 128  }
 0x34b   : > { %977 = vsyncadd (%p796_p12), %s571_s15, 4294967168  ;;  %p21_p7 = scmp.ge.s32.totalorder %s1114_s23, 4   ;;  %s1290_s24 = smov %s984_s25 }
 0x34c   : > { %s1291_s25 = smov %s988_s26  ;;  %s1292_s26 = smov %s1130_s12 }
 0x34d   : > { %s1293_s27 = smov %s1114_s23  ;;  %23 = sbr.rel (!%p21_p7) target bundleno = 9 (0x9), region = 101 }
 0x352   :  { %576 = vsyncpa [#allocation3], 1 }
 0x353   :  { %578 = vsyncpa [#allocation3 + $0x1], 1 }
 0x354   :  { %579 = vsyncpa [#allocation6], 1 }
 0x355   :  { %580 = vsyncpa [#allocation4], 1 }
 0x356   :  { %582 = vsyncpa [#allocation4 + $0x1], 1 }

</bundles_post_ra>
